<compile_context>
chip_gen: v7x
topology: tpu7x:2x2x1
jax: 0.10.0
libtpu: 0.0.40
codegen_flags: <defaults>
</compile_context>

<pallas_src>
import functools

import jax
import jax.numpy as jnp
from jax.experimental import pallas as pl
from jax.experimental.pallas import tpu as pltpu


def _round_up(n, m):
    return ((n + m - 1) // m) * m


def mlp_kernel(x_ref, w1_ref, b1_ref, w2_ref, b2_ref, o_ref, acc_ref, *,
               compute_dtype, precision):
    # Grid: (batch tile i, hidden chunk h). Accumulate over h into an f32 scratch.
    @pl.when(pl.program_id(1) == 0)
    def _():
        acc_ref[...] = jnp.zeros_like(acc_ref)

    x = x_ref[...].astype(compute_dtype)                       # cast in-kernel (no wrapper pass)
    h = jnp.dot(x, w1_ref[...], preferred_element_type=jnp.float32,
                precision=precision)
    h = jnp.maximum(h + b1_ref[...], 0.0)                      # bias + ReLU in f32 (VPU)
    acc_ref[...] += jnp.dot(h.astype(w2_ref.dtype), w2_ref[...],
                            preferred_element_type=jnp.float32,
                            precision=precision)

    @pl.when(pl.program_id(1) == pl.num_programs(1) - 1)
    def _():
        o_ref[...] = (acc_ref[...] + b2_ref[...]).astype(o_ref.dtype)


def _spec(shape, index_map, single_buffer=False):
    """BlockSpec; grid-invariant operands get a single VMEM buffer."""
    if single_buffer and hasattr(pl, "Buffered"):
        try:
            return pl.BlockSpec(shape, index_map, pipeline_mode=pl.Buffered(1))
        except TypeError:
            pass
    return pl.BlockSpec(shape, index_map)


def prepare_params(w1_t, b1, w2_t, b2, compute_dtype=jnp.bfloat16):
    """Pad + cast weights/biases once (batch-independent).

    w1_t: [D_in, H], b1: [H] or [1, H], w2_t: [H, D_out], b2: [D_out] or [1, D_out].
    Zero padding is exact: padded K rows/cols contribute 0, padded hidden units
    have zero weight+bias -> ReLU(0)=0 -> no effect on the result.
    """
    D_in, H = w1_t.shape
    D_out = w2_t.shape[1]
    Dp_in, Hp, Dp_out = _round_up(D_in, 128), _round_up(H, 128), _round_up(D_out, 128)

    w1p = jnp.zeros((Dp_in, Hp), compute_dtype).at[:D_in, :H].set(
        w1_t.astype(compute_dtype))
    b1p = jnp.zeros((1, Hp), jnp.float32).at[:, :H].set(
        b1.reshape(1, H).astype(jnp.float32))
    w2p = jnp.zeros((Hp, Dp_out), compute_dtype).at[:H, :D_out].set(
        w2_t.astype(compute_dtype))
    b2p = jnp.zeros((1, Dp_out), jnp.float32).at[:, :D_out].set(
        b2.reshape(1, D_out).astype(jnp.float32))
    return (w1p, b1p, w2p, b2p), (D_in, H, D_out)


@functools.partial(jax.jit,
                   static_argnames=("logical_dims", "compute_dtype", "tile_m"))
def neural_net_forward(x, w1p, b1p, w2p, b2p, logical_dims,
                       compute_dtype=jnp.bfloat16, tile_m=512):
    """x: [B, D_in]; padded params from prepare_params; logical_dims=(D_in, H, D_out)."""
    D_in, H, D_out = logical_dims
    B = x.shape[0]
    if x.shape[1] != D_in:
        raise ValueError("x feature dim does not match w1")
    out_dtype = x.dtype

    Dp_in, Hp = w1p.shape
    Dp_out = w2p.shape[1]

    x_size = jnp.dtype(x.dtype).itemsize
    w_size = jnp.dtype(w1p.dtype).itemsize
    cdt_size = jnp.dtype(compute_dtype).itemsize
    out_size = jnp.dtype(out_dtype).itemsize
    sublane = 16 if cdt_size == 2 else 8

    # ---- generation-aware VMEM budget (v5e/v6e 128 MiB, v7x 64 MiB per TC) ----
    try:
        vmem_cap = int(pltpu.get_tpu_info().vmem_capacity_bytes)
    except Exception:
        vmem_cap = 64 * 1024 * 1024          # conservative fallback (v7x per-TC)
    budget = int(0.75 * vmem_cap)
    vmem_ceiling = int(0.875 * vmem_cap)     # never request the full physical VMEM

    # ---- pick batch tile TM ----
    TM = min(tile_m, _round_up(B, sublane))
    if TM >= 256:
        TM = _round_up(TM, 256)              # full 256x256 systolic fill (v6e/v7x)
    elif TM >= 128:
        TM = _round_up(TM, 128)
    # Megacore: if one tile would cover a large B, split so both v7x TCs get work.
    if B >= 512 and TM >= B:
        TM = _round_up((B + 1) // 2, 256)

    def _footprint(tm, th, nbuf_w):
        return (2 * tm * Dp_in * x_size                         # x tiles (double-buffered)
                + nbuf_w * (Dp_in * th + th * Dp_out) * w_size  # w1 + w2 tiles
                + nbuf_w * th * 4 + Dp_out * 4                  # b1 tiles + b2
                + 2 * tm * Dp_out * out_size                    # out tiles
                + tm * Dp_out * 4                               # f32 accumulator scratch
                + tm * th * (4 + cdt_size))                     # live intermediate h (+ cast)

    # ---- pick hidden chunk TH (divisor of Hp, multiple of 128) ----
    th_candidates = [th for th in range(Hp, 0, -128) if Hp % th == 0]
    TH = th_candidates[-1]
    for th in th_candidates:
        if _footprint(TM, th, 1 if th == Hp else 2) <= budget:
            TH = th
            break
    else:
        # Even TH=128 does not fit: shrink TM as a last resort.
        while TM > sublane and _footprint(TM, TH, 2) > budget:
            TM = max(sublane, _round_up(TM // 2, sublane))

    B_pad = _round_up(B, TM)
    num_m = B_pad // TM
    num_h = Hp // TH
    nbuf_w = 1 if num_h == 1 else 2

    need = _footprint(TM, TH, nbuf_w)
    vmem_limit = int(min(max(need + (2 << 20), 16 << 20), vmem_ceiling))

    # ---- pad x only when needed (cast happens inside the kernel) ----
    if B_pad != B or Dp_in != D_in:
        xp = jnp.zeros((B_pad, Dp_in), x.dtype).at[:B, :D_in].set(x)
    else:
        xp = x

    precision = (jax.lax.Precision.HIGHEST
                 if jnp.dtype(compute_dtype) == jnp.float32 else None)
    kernel = functools.partial(mlp_kernel, compute_dtype=compute_dtype,
                               precision=precision)

    cost = pl.CostEstimate(
        flops=2 * B * (D_in * H + H * D_out),
        transcendentals=0,
        bytes_accessed=int(B * D_in * x_size
                           + (Dp_in * Hp + Hp * Dp_out) * w_size
                           + (Hp + Dp_out) * 4
                           + B * D_out * out_size),
    )

    out_padded = pl.pallas_call(
        kernel,
        out_shape=jax.ShapeDtypeStruct((B_pad, Dp_out), out_dtype),
        grid=(num_m, num_h),
        in_specs=[
            _spec((TM, Dp_in), lambda i, h: (i, 0), single_buffer=(num_m == 1)),
            _spec((Dp_in, TH), lambda i, h: (0, h), single_buffer=(num_h == 1)),
            _spec((1, TH),     lambda i, h: (0, h), single_buffer=(num_h == 1)),
            _spec((TH, Dp_out), lambda i, h: (h, 0), single_buffer=(num_h == 1)),
            _spec((1, Dp_out), lambda i, h: (0, 0), single_buffer=True),
        ],
        out_specs=pl.BlockSpec((TM, Dp_out), lambda i, h: (i, 0)),
        scratch_shapes=[pltpu.VMEM((TM, Dp_out), jnp.float32)],
        compiler_params=pltpu.CompilerParams(
            dimension_semantics=("parallel", "arbitrary"),
            vmem_limit_bytes=vmem_limit,
        ),
        cost_estimate=cost,
    )(xp, w1p, b1p, w2p, b2p)

    if B_pad == B and Dp_out == D_out:
        return out_padded
    return out_padded[:B, :D_out]


def init_params(key, input_dim, hidden_dim, output_dim, dtype=jnp.float32):
    """Deterministic init mimicking nn.Linear default (uniform +/- 1/sqrt(fan_in))."""
    k1, k2, k3, k4 = jax.random.split(key, 4)
    bound1 = 1.0 / (input_dim ** 0.5)
    bound2 = 1.0 / (hidden_dim ** 0.5)
    # Stored transposed: [in, out]
    w1_t = jax.random.uniform(k1, (input_dim, hidden_dim), dtype, -bound1, bound1)
    b1 = jax.random.uniform(k2, (1, hidden_dim), dtype, -bound1, bound1)
    w2_t = jax.random.uniform(k3, (hidden_dim, output_dim), dtype, -bound2, bound2)
    b2 = jax.random.uniform(k4, (1, output_dim), dtype, -bound2, bound2)
    return w1_t, b1, w2_t, b2


if __name__ == "__main__":
    input_dim, hidden_dim, output_dim = 32, 64, 16
    batch = 8

    key = jax.random.PRNGKey(0)
    kx, kp = jax.random.split(key)
    x = jax.random.normal(kx, (batch, input_dim), jnp.float32)
    w1_t, b1, w2_t, b2 = init_params(kp, input_dim, hidden_dim, output_dim)

    # Pure-JAX reference (same math as the PyTorch forward).
    ref = jnp.maximum(x @ w1_t + b1, 0.0) @ w2_t + b2

    # Default bf16-on-MXU path (weights padded/cast once; looser tolerance).
    params_bf16, dims = prepare_params(w1_t, b1, w2_t, b2,
                                       compute_dtype=jnp.bfloat16)
    out_bf16 = neural_net_forward(x, *params_bf16, logical_dims=dims,
                                  compute_dtype=jnp.bfloat16)
    out_bf16 = jax.block_until_ready(out_bf16)
    assert out_bf16.shape == (batch, output_dim)
    assert jnp.allclose(out_bf16, ref, atol=5e-2, rtol=5e-2)

    # Explicit f32 path (Precision.HIGHEST on the MXU, tight tolerance).
    params_f32, dims = prepare_params(w1_t, b1, w2_t, b2,
                                      compute_dtype=jnp.float32)
    out_f32 = neural_net_forward(x, *params_f32, logical_dims=dims,
                                 compute_dtype=jnp.float32)
    out_f32 = jax.block_until_ready(out_f32)
    assert out_f32.shape == (batch, output_dim)
    assert jnp.allclose(out_f32, ref, atol=1e-5, rtol=1e-5)

    print("KERNEL_OK")
</pallas_src>

<mosaic_0001>
module attributes {stable_mosaic.version = 11 : i64} {
  func.func @mlp_kernel(%arg0: i32, %arg1: i32, %arg2: memref<16x128xf32, #tpu.memory_space<vmem>>, %arg3: memref<128x128xbf16, #tpu.memory_space<vmem>>, %arg4: memref<1x128xf32, #tpu.memory_space<vmem>>, %arg5: memref<128x128xbf16, #tpu.memory_space<vmem>>, %arg6: memref<1x128xf32, #tpu.memory_space<vmem>>, %arg7: memref<16x128xf32, #tpu.memory_space<vmem>>, %arg8: memref<16x128xf32, #tpu.memory_space<vmem>>) attributes {dimension_semantics = [#tpu.dimension_semantics<parallel>, #tpu.dimension_semantics<arbitrary>], iteration_bounds = array<i64: 1, 1>, scalar_prefetch = 0 : i64, scratch_operands = 1 : i64, tpu.core_type = #tpu.core_type<tc>, window_params = [{pipeline_mode = #tpu.pipeline_mode<synchronous>, transform_indices = @transform_0, window_bounds = array<i64: 16, 128>}, {pipeline_mode = #tpu.pipeline_mode<synchronous>, transform_indices = @transform_1, window_bounds = array<i64: 128, 128>}, {pipeline_mode = #tpu.pipeline_mode<synchronous>, transform_indices = @transform_2, window_bounds = array<i64: 1, 128>}, {pipeline_mode = #tpu.pipeline_mode<synchronous>, transform_indices = @transform_3, window_bounds = array<i64: 128, 128>}, {pipeline_mode = #tpu.pipeline_mode<synchronous>, transform_indices = @transform_4, window_bounds = array<i64: 1, 128>}, {transform_indices = @transform_5, window_bounds = array<i64: 16, 128>}]} {
    %c0_i32 = arith.constant 0 : i32
    %0 = arith.cmpi eq, %arg1, %c0_i32 : i32
    %1 = arith.extui %0 : i1 to i32
    %c0_i32_0 = arith.constant 0 : i32
    %2 = arith.cmpi ne, %1, %c0_i32_0 : i32
    scf.if %2 {
      %cst_16 = arith.constant 0.000000e+00 : f32
      %21 = vector.broadcast %cst_16 : f32 to vector<16x128xf32>
      %c0_17 = arith.constant 0 : index
      %c0_18 = arith.constant 0 : index
      %22 = vector.load %arg8[%c0_17, %c0_18] : memref<16x128xf32, #tpu.memory_space<vmem>>, vector<16x128xf32>
      tpu.vector_store %arg8[%c0_17, %c0_18], %21 {strides = array<i32>} : memref<16x128xf32, #tpu.memory_space<vmem>>, vector<16x128xf32>,
    } else {
    }
    %c0 = arith.constant 0 : index
    %c0_1 = arith.constant 0 : index
    %3 = vector.load %arg2[%c0, %c0_1] : memref<16x128xf32, #tpu.memory_space<vmem>>, vector<16x128xf32>
    %4 = arith.truncf %3 : vector<16x128xf32> to vector<16x128xbf16>
    %c0_2 = arith.constant 0 : index
    %c0_3 = arith.constant 0 : index
    %5 = vector.load %arg3[%c0_2, %c0_3] : memref<128x128xbf16, #tpu.memory_space<vmem>>, vector<128x128xbf16>
    %cst = arith.constant dense<0.000000e+00> : vector<16x128xf32>
    %6 = tpu.matmul %4, %5, %cst {dimension_numbers = #tpu.dot_dimension_numbers<[1], [0], [0], [1], [0, 0, 1, 1], [], []>} : vector<16x128xbf16>, vector<128x128xbf16>, vector<16x128xf32> -> vector<16x128xf32>
    %c0_4 = arith.constant 0 : index
    %c0_5 = arith.constant 0 : index
    %7 = vector.load %arg4[%c0_4, %c0_5] : memref<1x128xf32, #tpu.memory_space<vmem>>, vector<1x128xf32>
    %8 = vector.broadcast %7 : vector<1x128xf32> to vector<16x128xf32>
    %9 = arith.addf %6, %8 : vector<16x128xf32>
    %cst_6 = arith.constant 0.000000e+00 : f32
    %10 = vector.broadcast %cst_6 : f32 to vector<16x128xf32>
    %11 = arith.maximumf %9, %10 : vector<16x128xf32>
    %c0_7 = arith.constant 0 : index
    %c0_8 = arith.constant 0 : index
    %12 = vector.load %arg8[%c0_7, %c0_8] : memref<16x128xf32, #tpu.memory_space<vmem>>, vector<16x128xf32>
    %13 = arith.truncf %11 : vector<16x128xf32> to vector<16x128xbf16>
    %c0_9 = arith.constant 0 : index
    %c0_10 = arith.constant 0 : index
    %14 = vector.load %arg5[%c0_9, %c0_10] : memref<128x128xbf16, #tpu.memory_space<vmem>>, vector<128x128xbf16>
    %cst_11 = arith.constant dense<0.000000e+00> : vector<16x128xf32>
    %15 = tpu.matmul %13, %14, %cst_11 {dimension_numbers = #tpu.dot_dimension_numbers<[1], [0], [0], [1], [0, 0, 1, 1], [], []>} : vector<16x128xbf16>, vector<128x128xbf16>, vector<16x128xf32> -> vector<16x128xf32>
    %16 = arith.addf %12, %15 : vector<16x128xf32>
    %c0_12 = arith.constant 0 : index
    %c0_13 = arith.constant 0 : index
    %17 = vector.load %arg8[%c0_12, %c0_13] : memref<16x128xf32, #tpu.memory_space<vmem>>, vector<16x128xf32>
    tpu.vector_store %arg8[%c0_12, %c0_13], %16 {strides = array<i32>} : memref<16x128xf32, #tpu.memory_space<vmem>>, vector<16x128xf32>,
    %c0_i32_14 = arith.constant 0 : i32
    %18 = arith.cmpi eq, %arg1, %c0_i32_14 : i32
    %19 = arith.extui %18 : i1 to i32
    %c0_i32_15 = arith.constant 0 : i32
    %20 = arith.cmpi ne, %19, %c0_i32_15 : i32
    scf.if %20 {
      %c0_16 = arith.constant 0 : index
      %c0_17 = arith.constant 0 : index
      %21 = vector.load %arg8[%c0_16, %c0_17] : memref<16x128xf32, #tpu.memory_space<vmem>>, vector<16x128xf32>
      %c0_18 = arith.constant 0 : index
      %c0_19 = arith.constant 0 : index
      %22 = vector.load %arg6[%c0_18, %c0_19] : memref<1x128xf32, #tpu.memory_space<vmem>>, vector<1x128xf32>
      %23 = vector.broadcast %22 : vector<1x128xf32> to vector<16x128xf32>
      %24 = arith.addf %21, %23 : vector<16x128xf32>
      %c0_20 = arith.constant 0 : index
      %c0_21 = arith.constant 0 : index
      %25 = vector.load %arg7[%c0_20, %c0_21] : memref<16x128xf32, #tpu.memory_space<vmem>>, vector<16x128xf32>
      tpu.vector_store %arg7[%c0_20, %c0_21], %24 {strides = array<i32>} : memref<16x128xf32, #tpu.memory_space<vmem>>, vector<16x128xf32>,
    } else {
    }
    return
  }
  func.func @transform_0(%arg0: i32, %arg1: i32) -> (i32, i32) {
    %c0_i32 = arith.constant 0 : i32
    %c0_i32_0 = arith.constant 0 : i32
    return %arg0, %c0_i32 : i32, i32
  }
  func.func @transform_1(%arg0: i32, %arg1: i32) -> (i32, i32) {
    %c0_i32 = arith.constant 0 : i32
    %c0_i32_0 = arith.constant 0 : i32
    return %c0_i32, %arg1 : i32, i32
  }
  func.func @transform_2(%arg0: i32, %arg1: i32) -> (i32, i32) {
    %c0_i32 = arith.constant 0 : i32
    %c0_i32_0 = arith.constant 0 : i32
    return %c0_i32, %arg1 : i32, i32
  }
  func.func @transform_3(%arg0: i32, %arg1: i32) -> (i32, i32) {
    %c0_i32 = arith.constant 0 : i32
    %c0_i32_0 = arith.constant 0 : i32
    return %arg1, %c0_i32 : i32, i32
  }
  func.func @transform_4(%arg0: i32, %arg1: i32) -> (i32, i32) {
    %c0_i32 = arith.constant 0 : i32
    %c0_i32_0 = arith.constant 0 : i32
    %c0_i32_1 = arith.constant 0 : i32
    return %c0_i32, %c0_i32_0 : i32, i32
  }
  func.func @transform_5(%arg0: i32, %arg1: i32) -> (i32, i32) {
    %c0_i32 = arith.constant 0 : i32
    %c0_i32_0 = arith.constant 0 : i32
    return %arg0, %c0_i32 : i32, i32
  }
}

</mosaic_0001>

<bundles_post_ra>
// kernel: neural_net_forward.1
= control target key start
LH: loop header
LB: loop body
LE: loop exit
PB: predicated region body
PF: predicated region fallthrough
CT: control target
= control target key end

     0   :  { %10 = vsyncpa [#allocation4], 0  ;;  %s530_s0 = inlined_call_operand.vmem [shape: f32[16,128], index: 0, kind: input, shape index: {}]   ;;  %s531_s1 = inlined_call_operand.hbm [shape: bf16[128,128], index: 1, kind: input, shape index: {}]   ;;  %s532_s2 = inlined_call_operand.vmem [shape: f32[1,128], index: 2, kind: input, shape index: {}]   ;;  %s533_s3 = inlined_call_operand.hbm [shape: bf16[128,128], index: 3, kind: input, shape index: {}]   ;;  %s534_s4 = inlined_call_operand.vmem [shape: f32[1,128], index: 4, kind: input, shape index: {}]   ;;  %s535_s5 = inlined_call_operand.vmem [shape: f32[16,128], index: 5, kind: output, shape index: {}]  }
   0x1   :  { %11 = vsyncpa [#allocation6], 0  ;;  %s452_s18 = smov [#allocation3]   ;;  %s404_s22 = scalar_lea.hbm %s531_s1, 1024 }
   0x2   :  { %s19_s19 = sshll.u32 %s452_s18, 4  ;;  %p405_p0 = scmp.ne.s32.totalorder %s531_s1, %s404_s22  ;;  %s20_s19 = int_to_ptr.vmem [resolvable:$true] %s19_s19 }
   0x3   :  { %p408_p1 = scmp.lt.u32.totalorder %s404_s22, %s531_s1 }
   0x5   :  { %p410_p2 = pnand %p408_p1, %p405_p0 }
   0x7   :  { %413 = shalt.err (!%p410_p2)
}
   0x8   :  { %s414_s27 = scalar_lea.vmem %s20_s19, 1024  ;;  %p419_p4 = scmp.lt.s32.totalorder %s20_s19, %s20_s19 }
   0x9   :  { %p415_p3 = scmp.ne.s32.totalorder %s20_s19, %s414_s27  ;;  %p420_p5 = scmp.lt.s32.totalorder %s414_s27, %s414_s27 }
   0xb   :  { %p421_p6 = por %p420_p5, %p419_p4 }
   0xd   :  { %p422_p7 = pnand %p421_p6, %p415_p3 }
   0xf   :  { %425 = shalt.err (!%p422_p7)
}
  0x10   :  { %s453_s28 = smov 64   ;;  %s454_s29 = smov 4  }
  0x11   :  { %25 = dma.hbm_to_vmem [thread:$0]  %s531_s1, 1024, %s20_s19, [#allocation4], %s453_s28, %s453_s28, %s454_s29  }
  0x12   :  { %s455_s7 = smov [#allocation5]   ;;  %s426_s11 = scalar_lea.hbm %s533_s3, 1024 }
  0x13   :  { %s33_s8 = sshll.u32 %s455_s7, 4  ;;  %p427_p8 = scmp.ne.s32.totalorder %s533_s3, %s426_s11  ;;  %s34_s8 = int_to_ptr.vmem [resolvable:$true] %s33_s8 }
  0x14   :  { %p430_p9 = scmp.lt.u32.totalorder %s426_s11, %s533_s3 }
  0x16   :  { %p432_p10 = pnand %p430_p9, %p427_p8 }
  0x18   :  { %435 = shalt.err (!%p432_p10)
}
  0x19   :  { %s436_s16 = scalar_lea.vmem %s34_s8, 1024  ;;  %p441_p12 = scmp.lt.s32.totalorder %s34_s8, %s34_s8 }
  0x1a   :  { %p437_p11 = scmp.ne.s32.totalorder %s34_s8, %s436_s16  ;;  %p442_p13 = scmp.lt.s32.totalorder %s436_s16, %s436_s16 }
  0x1c   :  { %p443_p0 = por %p442_p13, %p441_p12 }
  0x1e   :  { %p444_p1 = pnand %p443_p0, %p437_p11 }
  0x20   :  { %447 = shalt.err (!%p444_p1)
}
  0x21   :  { %39 = dma.hbm_to_vmem [thread:$0]  %s533_s3, 1024, %s34_s8, [#allocation6], %s453_s28, %s453_s28, %s454_s29  }
  0x22   :  { %448 = dma.done.wait [#allocation4], 1024  }
  0x23   :  { %449 = vsyncadd [#allocation4], 4294966272 }
  0x24   :  { %450 = dma.done.wait [#allocation6], 1024  }
  0x25   :  { %451 = vsyncadd [#allocation6], 4294966272  ;;  %v456_v0 = vmov 0.0   ;;  %vm457_vm0 = vmmov 0   ;;  %v388_v1 = vld [vmem:[#allocation3] sm:$0xff]   ;;  %v389_v2 = vld [vmem:[#allocation3 + $0x8] sm:$0xff]  }
  0x26   :  { %342 = vmatprep.subr.bf16.mxu0 %v456_v0  ;;  %358 = vmatprep.mubr.msk.bf16.mxu0 %vm457_vm0, %v456_v0  ;;  %v390_v3 = vld [vmem:[#allocation3 + $0x10] sm:$0xff]   ;;  %v396_v4 = vld [vmem:[#allocation5] sm:$0xff]   ;;  %v391_v5 = vld [vmem:[#allocation3 + $0x18] sm:$0xff]  }
  0x27   :  { %362 = vmatprep.subr.bf16.mxu1 %v456_v0  ;;  %378 = vmatprep.mubr.msk.bf16.mxu1 %vm457_vm0, %v456_v0  ;;  %v397_v6 = vld [vmem:[#allocation5 + $0x8] sm:$0xff]   ;;  %v392_v7 = vld [vmem:[#allocation3 + $0x20] sm:$0xff]   ;;  %v398_v8 = vld [vmem:[#allocation5 + $0x10] sm:$0xff]  }
  0x28   :  { %343 = vmatpush3.bf16.msra.mxu0 %v388_v1  ;;  %363 = vmatpush3.bf16.msra.mxu1 %v396_v4  ;;  %v393_v9 = vld [vmem:[#allocation3 + $0x28] sm:$0xff]   ;;  %v399_v10 = vld [vmem:[#allocation5 + $0x18] sm:$0xff]   ;;  %v394_v11 = vld [vmem:[#allocation3 + $0x30] sm:$0xff]  }
  0x29   :  { %344 = vmatprep.subr.bf16.mxu0 %v456_v0  ;;  %364 = vmatprep.subr.bf16.mxu1 %v456_v0  ;;  %v400_v12 = vld [vmem:[#allocation5 + $0x20] sm:$0xff]   ;;  %v395_v13 = vld [vmem:[#allocation3 + $0x38] sm:$0xff]   ;;  %v56_v15 = vld [vmem:[%s530_s0 + $0x8] sm:$0xff] }
  0x2a   :  { %v55_v14 = vld [vmem:[%s530_s0] sm:$0xff]  ;;  %v401_v16 = vld [vmem:[#allocation5 + $0x28] sm:$0xff]   ;;  %v402_v18 = vld [vmem:[#allocation5 + $0x30] sm:$0xff]  }
  0x2b   :  { %v57_v17 = vpack.c.bf16 %v56_v15, %v55_v14  ;;  %v403_v19 = vld [vmem:[#allocation5 + $0x38] sm:$0xff]   ;;  %v306_v20 = vld [vmem:[%s532_s2] ss:$0 sm:$0xff] }
  0x2c   :  { %345 = vmatpush3.bf16.msra.mxu0 %v389_v2  ;;  %365 = vmatpush3.bf16.msra.mxu1 %v397_v6  ;;  %v323_v30 = vld [vmem:[%s534_s4] ss:$0 sm:$0xff] }
  0x2d   :  { %346 = vmatprep.subr.bf16.mxu0 %v456_v0  ;;  %366 = vmatprep.subr.bf16.mxu1 %v456_v0 }
  0x30   :  { %347 = vmatpush3.bf16.msra.mxu0 %v390_v3  ;;  %367 = vmatpush3.bf16.msra.mxu1 %v398_v8 }
  0x31   :  { %348 = vmatprep.subr.bf16.mxu0 %v456_v0  ;;  %368 = vmatprep.subr.bf16.mxu1 %v456_v0 }
  0x34   :  { %349 = vmatpush3.bf16.msra.mxu0 %v391_v5  ;;  %369 = vmatpush3.bf16.msra.mxu1 %v399_v10 }
  0x35   :  { %350 = vmatprep.subr.bf16.mxu0 %v456_v0  ;;  %370 = vmatprep.subr.bf16.mxu1 %v456_v0 }
  0x38   :  { %351 = vmatpush3.bf16.msra.mxu0 %v392_v7  ;;  %371 = vmatpush3.bf16.msra.mxu1 %v400_v12 }
  0x39   :  { %352 = vmatprep.subr.bf16.mxu0 %v456_v0  ;;  %372 = vmatprep.subr.bf16.mxu1 %v456_v0 }
  0x3c   :  { %353 = vmatpush3.bf16.msra.mxu0 %v393_v9  ;;  %373 = vmatpush3.bf16.msra.mxu1 %v401_v16 }
  0x3d   :  { %354 = vmatprep.subr.bf16.mxu0 %v456_v0  ;;  %374 = vmatprep.subr.bf16.mxu1 %v456_v0 }
  0x40   :  { %355 = vmatpush3.bf16.msra.mxu0 %v394_v11  ;;  %375 = vmatpush3.bf16.msra.mxu1 %v402_v18 }
  0x41   :  { %356 = vmatprep.subr.bf16.mxu0 %v456_v0  ;;  %376 = vmatprep.subr.bf16.mxu1 %v456_v0 }
  0x44   :  { %357 = vmatpush3.bf16.msra.mxu0 %v395_v13  ;;  %377 = vmatpush3.bf16.msra.mxu1 %v403_v19 }
  0x47   :  { %359 = vmatmul.mubr.bf16.vlgmr.msra.gmra.mrb[0].mxu0 %v57_v17 }
 0x11a   :  { %v163_v21 = vpop.f32.mrb[0].mxu0 }
 0x11b   :  { %v164_v22 = vadd.f32 %v306_v20, %v163_v21  ;;  %v360_v23 = vpop.f32.mrb[1].mxu0 }
 0x11c   :  { %v166_v24 = vpop.f32.mrb[2].mxu0 }
 0x11d   :  { %v167_v25 = vadd.f32 %v306_v20, %v166_v24  ;;  %v361_v26 = vpop.f32.mrb[3].mxu0  ;;  %v170_v27 = vmax.f32 %v164_v22, 0.0 }
 0x11f   :  { %v171_v28 = vmax.f32 %v167_v25, 0.0 }
 0x121   :  { %v174_v29 = vpack.c.bf16 %v171_v28, %v170_v27 }
 0x123   :  { %379 = vmatmul.mubr.bf16.vlgmr.msra.gmra.mrb[0].mxu1 %v174_v29 }
 0x1f6   :  { %v273_v31 = vpop.f32.mrb[0].mxu1 }
 0x1f7   :  { %v296_v32 = vadd.f32 %v323_v30, %v273_v31  ;;  %v380_v33 = vpop.f32.mrb[1].mxu1 }
 0x1f8   :  { %v276_v34 = vpop.f32.mrb[2].mxu1 }
 0x1f9   :  { %298 = vst [vmem:[%s535_s5] sm:$0xff] %v296_v32  ;;  %v297_v35 = vadd.f32 %v323_v30, %v276_v34  ;;  %v381_v36 = vpop.f32.mrb[3].mxu1 }
 0x1fb   :  { %299 = vst [vmem:[%s535_s5 + $0x8] sm:$0xff] %v297_v35 }
 0x1fc   :  { %304 = vsyncpa [#allocation4], 1 }
 0x1fd   :  { %305 = vsyncpa [#allocation6], 1 }

</bundles_post_ra>
